<compile_context>
chip_gen: v7x
topology: tpu7x:2x2x1
jax: 0.10.0
libtpu: 0.0.40
codegen_flags: <defaults>
</compile_context>

<pallas_src>
import jax
import jax.numpy as jnp
from jax import lax
from jax.experimental import pallas as pl
from jax.experimental.pallas import tpu as pltpu


def _round_up(x, m):
    return ((x + m - 1) // m) * m


def _pick_row_tile(m2, tm2_max):
    """Pick the folded-row tile size.

    Goals: >= 2 grid steps (so v7x megacore has work for both TCs), an even
    step count when it matters, tiles that are a multiple of 16 sublanes
    (bf16-friendly), capped at tm2_max (VMEM budget).
    """
    if m2 <= 16:
        return 16
    n = max(2, -(-m2 // tm2_max))
    if n % 2:
        n += 1
    return _round_up(-(-m2 // n), 16)


def _conv_mm_kernel(patches_ref, w_ref, other_ref, out_ref):
    # patches_ref: (TM2, Kd)  bf16   folded patch rows (streamed, pipelined)
    # w_ref:       (Kd, Cd)   bf16   block-diagonal weights (VMEM resident)
    # other_ref:   (1, 1)     f32    the "+ other" scalar (SMEM)
    # out_ref:     (TM2, Cd)  f32    lane-dense (128-wide) output tile
    acc = jnp.dot(patches_ref[...], w_ref[...],
                  preferred_element_type=jnp.float32)
    out_ref[...] = acc + other_ref[0, 0]


def conv2d_s2_p1_add(x_nchw, weight_oihw, other=0.0, *, tm2=2048):
    """Conv2d(32->64, k=3, stride=2, padding=1, bias=False) + other (PyTorch semantics)."""
    N, Cin, H, W = x_nchw.shape
    Cout, Cin_w, KH, KW = weight_oihw.shape
    assert Cin == Cin_w and KH == 3 and KW == 3
    stride, pad = 2, 1
    Ho = (H + 2 * pad - KH) // stride + 1
    Wo = (W + 2 * pad - KW) // stride + 1

    # ---- wrapper glue (XLA): cast to bf16 FIRST so every intermediate
    # (transpose / pad / strided slices / concat / patch matrix) is half-width.
    xb = x_nchw.astype(jnp.bfloat16)
    xb = jnp.transpose(xb, (0, 2, 3, 1))                       # NCHW -> NHWC
    xb = jnp.pad(xb, ((0, 0), (pad, pad), (pad, pad), (0, 0)))
    cols = []
    for di in range(KH):
        for dj in range(KW):
            cols.append(
                xb[:, di:di + stride * Ho:stride, dj:dj + stride * Wo:stride, :])
    patches = jnp.concatenate(cols, axis=-1)                   # (N, Ho, Wo, K) bf16

    M = N * Ho * Wo
    K = KH * KW * Cin                 # 288 -- no K padding: DMA real bytes only
    Cd = 2 * Cout                     # 128 -- lane-dense output
    Kd = 2 * K                        # 576 -- folded K (equals full array dim)

    M2 = -(-M // 2)                   # folded (pair-of-rows) count
    TM2 = _pick_row_tile(M2, tm2)
    n_steps = -(-M2 // TM2)
    M2p = n_steps * TM2
    Mp = 2 * M2p

    # Single pad (rows only), then a contiguous (free) reshape folds row pairs.
    patches2d = jnp.pad(patches.reshape(M, K), ((0, Mp - M), (0, 0)))
    patches_fold = patches2d.reshape(M2p, Kd)

    # (Cout, Cin, KH, KW) -> (KH, KW, Cin, Cout) -> (K, Cout), placed on a block
    # diagonal so out cols [0:64] = even patch rows, [64:128] = odd patch rows.
    w2d = jnp.transpose(weight_oihw.astype(jnp.bfloat16), (2, 3, 1, 0)).reshape(K, Cout)
    w_dense = jnp.zeros((Kd, Cd), jnp.bfloat16)
    w_dense = w_dense.at[:K, :Cout].set(w2d)
    w_dense = w_dense.at[K:, Cout:].set(w2d)

    other_arr = jnp.asarray(other, dtype=jnp.float32).reshape(1, 1)

    # Pipeline depths: 3-deep on the streamed (mem-bound) patch operand, capped
    # by the step count; weights/out keep the default double buffer.
    patch_bufs = min(3, max(2, n_steps))

    # VMEM working-set estimate; only raise the scoped-VMEM limit if needed
    # (v5e default is 16 MiB; v6e/v7x are 32 MiB).
    vmem_bytes = (patch_bufs * TM2 * Kd * 2      # streamed patch buffers (bf16)
                  + 2 * TM2 * Cd * 4             # double-buffered f32 output
                  + 2 * Kd * Cd * 2)             # resident weights
    vmem_limit = None
    if vmem_bytes > (14 << 20):
        vmem_limit = min(vmem_bytes + (4 << 20), 64 << 20)

    # Honest (useful-work) cost estimate.
    flops = 2 * M * K * Cout
    bytes_accessed = (M * K + K * Cout) * 2 + M * Cout * 4

    out_dense = pl.pallas_call(
        _conv_mm_kernel,
        out_shape=jax.ShapeDtypeStruct((M2p, Cd), jnp.float32),
        grid=(n_steps,),
        in_specs=[
            pl.BlockSpec((TM2, Kd), lambda i: (i, 0),
                         pipeline_mode=pl.Buffered(patch_bufs)),  # streamed patches
            pl.BlockSpec((Kd, Cd), lambda i: (0, 0)),             # resident weights
            pl.BlockSpec(memory_space=pltpu.SMEM),                # "+ other" scalar
        ],
        out_specs=pl.BlockSpec((TM2, Cd), lambda i: (i, 0)),
        compiler_params=pltpu.CompilerParams(
            dimension_semantics=("parallel",),                    # megacore on v7x
            vmem_limit_bytes=vmem_limit),
        cost_estimate=pl.CostEstimate(
            flops=flops, transcendentals=0, bytes_accessed=bytes_accessed),
    )(patches_fold, w_dense, other_arr)

    # Unfold: (M2p, 128) -> (Mp, 64) is the exact contiguous inverse of the row
    # pairing; drop padded rows and restore NCHW to match PyTorch exactly.
    out2d = out_dense.reshape(Mp, Cout)[:M]
    out = out2d.reshape(N, Ho, Wo, Cout)
    return jnp.transpose(out, (0, 3, 1, 2))


if __name__ == "__main__":
    key = jax.random.PRNGKey(0)
    kx, kw = jax.random.split(key)

    # Small shapes consistent with the module: Conv2d requires Cin=32.
    N, Cin, H, W = 2, 32, 16, 16
    Cout, KH, KW = 64, 3, 3

    x = jax.random.normal(kx, (N, Cin, H, W), dtype=jnp.float32)
    fan_in = Cin * KH * KW
    weight = jax.random.normal(kw, (Cout, Cin, KH, KW), dtype=jnp.float32) / jnp.sqrt(fan_in)
    other = 0.5

    out = conv2d_s2_p1_add(x, weight, other)
    out = jax.block_until_ready(out)
    assert out.shape == (N, Cout, 8, 8), out.shape

    # Reference check (f32 conv). bf16 inputs + f32 accumulation -> loose tol.
    ref = lax.conv_general_dilated(
        x, weight, window_strides=(2, 2), padding=((1, 1), (1, 1)),
        dimension_numbers=("NCHW", "OIHW", "NCHW")) + other
    max_err = float(jnp.max(jnp.abs(out - ref)))
    assert max_err < 1e-1, max_err

    print("KERNEL_OK")
</pallas_src>

<mosaic_0001>
module attributes {stable_mosaic.version = 11 : i64} {
  func.func @_conv_mm_kernel(%arg0: i32, %arg1: memref<32x576xbf16, #tpu.memory_space<vmem>>, %arg2: memref<576x128xbf16, #tpu.memory_space<vmem>>, %arg3: memref<1x1xf32, #tpu.memory_space<smem>>, %arg4: memref<32x128xf32, #tpu.memory_space<vmem>>) attributes {dimension_semantics = [#tpu.dimension_semantics<parallel>], iteration_bounds = array<i64: 2>, scalar_prefetch = 0 : i64, scratch_operands = 0 : i64, tpu.core_type = #tpu.core_type<tc>, window_params = [{pipeline_mode = #tpu.pipeline_mode<double_buffered>, transform_indices = @transform_0, window_bounds = array<i64: 32, 576>}, {pipeline_mode = #tpu.pipeline_mode<synchronous>, transform_indices = @transform_1, window_bounds = array<i64: 576, 128>}, {transform_indices = @transform_2, window_bounds = array<i64: 1, 1>}, {transform_indices = @transform_3, window_bounds = array<i64: 32, 128>}]} {
    %c0 = arith.constant 0 : index
    %c0_0 = arith.constant 0 : index
    %0 = vector.load %arg1[%c0, %c0_0] : memref<32x576xbf16, #tpu.memory_space<vmem>>, vector<32x576xbf16>
    %c0_1 = arith.constant 0 : index
    %c0_2 = arith.constant 0 : index
    %1 = vector.load %arg2[%c0_1, %c0_2] : memref<576x128xbf16, #tpu.memory_space<vmem>>, vector<576x128xbf16>
    %cst = arith.constant dense<0.000000e+00> : vector<32x128xf32>
    %2 = tpu.matmul %0, %1, %cst {dimension_numbers = #tpu.dot_dimension_numbers<[1], [0], [0], [1], [0, 0, 1, 1], [], []>} : vector<32x576xbf16>, vector<576x128xbf16>, vector<32x128xf32> -> vector<32x128xf32>
    %c0_3 = arith.constant 0 : index
    %c0_4 = arith.constant 0 : index
    %3 = memref.load %arg3[%c0_3, %c0_4] : memref<1x1xf32, #tpu.memory_space<smem>>
    %4 = vector.broadcast %3 : f32 to vector<32x128xf32>
    %5 = arith.addf %2, %4 : vector<32x128xf32>
    %c0_5 = arith.constant 0 : index
    %c0_6 = arith.constant 0 : index
    %6 = vector.load %arg4[%c0_5, %c0_6] : memref<32x128xf32, #tpu.memory_space<vmem>>, vector<32x128xf32>
    tpu.vector_store %arg4[%c0_5, %c0_6], %5 {strides = array<i32>} : memref<32x128xf32, #tpu.memory_space<vmem>>, vector<32x128xf32>,
    return
  }
  func.func @transform_0(%arg0: i32) -> (i32, i32) {
    %c0_i32 = arith.constant 0 : i32
    %c0_i32_0 = arith.constant 0 : i32
    return %arg0, %c0_i32 : i32, i32
  }
  func.func @transform_1(%arg0: i32) -> (i32, i32) {
    %c0_i32 = arith.constant 0 : i32
    %c0_i32_0 = arith.constant 0 : i32
    %c0_i32_1 = arith.constant 0 : i32
    return %c0_i32, %c0_i32_0 : i32, i32
  }
  func.func @transform_2(%arg0: i32) -> (i32, i32) {
    %c0_i32 = arith.constant 0 : i32
    %c0_i32_0 = arith.constant 0 : i32
    %c0_i32_1 = arith.constant 0 : i32
    return %c0_i32, %c0_i32_0 : i32, i32
  }
  func.func @transform_3(%arg0: i32) -> (i32, i32) {
    %c0_i32 = arith.constant 0 : i32
    %c0_i32_0 = arith.constant 0 : i32
    return %arg0, %c0_i32 : i32, i32
  }
}

</mosaic_0001>

<bundles_post_ra>
// kernel: tpu_custom_call.1
= control target key start
LH: loop header
LB: loop body
LE: loop exit
PB: predicated region body
PF: predicated region fallthrough
CT: control target
= control target key end

     0   :  { %s1446_s0 = inlined_call_operand.hbm [shape: bf16[64,576], index: 0, kind: input, shape index: {}]   ;;  %s1447_s1 = inlined_call_operand.hbm [shape: bf16[576,128], index: 1, kind: input, shape index: {}]   ;;  %s1448_s2 = inlined_call_operand.<no memory space> [shape: f32[1,1], index: 2, kind: input, shape index: {}]   ;;  %s1449_s3 = inlined_call_operand.hbm [shape: f32[64,128], index: 3, kind: output, shape index: {}]  }
   0x1   :  { %8 = sst [smem:[#allocation2]] %s1448_s2 }
   0x2   :  { %9 = vsyncpa [#allocation4], 0 }
   0x3   :  { %11 = vsyncpa [#allocation4 + $0x1], 0 }
   0x4   :  { %12 = vsyncpa [#allocation7], 0 }
   0x5   :  { %13 = vsyncpa [#allocation5], 0 }
   0x6   :  { %15 = vsyncpa [#allocation5 + $0x1], 0  ;;  %s1232_s14 = smov 0   ;;  %s1234_s15 = smov 0  }
   0x7   :  { %s1236_s16 = smov 0   ;;  %s1238_s17 = smov 0  }
   0x8 LB: > { %s1253_s2 = sadd.s32 4294967295, %s1198_s17   ;;  %s816_s18 = sadd.s32 4294967294, %s1198_s17   ;;  %s1198_s17 = sphi %s1238_s17, %s1469_s17   ;;  %s1194_s16 = sphi %s1236_s16, %s1468_s16   ;;  %s1190_s15 = sphi %s1234_s15, %s1467_s15   ;;  %s1186_s14 = sphi %s1232_s14, %s1466_s14  }
   0x9   : > { %p41_p0 = scmp.ne.s32.totalorder %s1190_s15, %s1186_s14  ;;  %p1450_p1 = scmp.eq.s32.totalorder %s1253_s2, 0 }
   0xa   : > { %p113_p3 = scmp.eq.s32.totalorder %s816_s18, 1  ;;  %p817_p5 = scmp.ge.s32.totalorder %s1198_s17, 1 }
   0xb   : > { %p1262_p4 = por %p1450_p1, %p41_p0  ;;  %p120_p7 = scmp.lt.s32.totalorder %s1198_s17, 3 }
   0xc   : > { %p1267_p6 = por %p113_p3, %p41_p0  ;;  %s1200_s22 = smov [#allocation6]  }
   0xd   : > { %s1453_s19 = scalar_select %p1262_p4, 1, 0 }
   0xe   : > { %s1454_s20 = scalar_select %p1267_p6, 1, 0 }
   0xf   : > { %p1272_p8 = pnand %p817_p5, %p120_p7  ;;  %s132_s23 = sshll.u32 %s1200_s22, 4  ;;  %s1276_s23 = int_to_ptr.vmem [resolvable:$true] %s132_s23 }
  0x10   : > { %s1288_s25 = sadd.s32 1, %s1198_s17   ;;  %s28_s26 = sadd.s32 1, %s1194_s16 }
  0x11   : > { %s1455_s21 = scalar_select %p1272_p8, 1, 0 }
  0x12   : > { %p965_p9 = pneg %p1272_p8  ;;  %s25_s27 = ssub.s32 %s1198_s17, %s1288_s25 }
  0x13   : > { %s1070_s30 = scalar_lea.hbm %s1447_s1, 4608 }
  0x14   : > { %p1283_p11 = pnand %p965_p9, %p1450_p1  ;;  %p1071_p12 = scmp.ne.s32.totalorder %s1447_s1, %s1070_s30 }
  0x15   : > { %p1077_p5 = scmp.lt.u32.totalorder %s1070_s30, %s1447_s1 }
  0x16   : > { %p1072_p13 = pneg %p1283_p11 }
  0x18   : > { %p1073_p0 = pnand %p1072_p13, %p1071_p12 }
  0x1a   : > { %p1074_p3 = pneg %p1073_p0 }
  0x1c   : > { %p1079_p7 = pnand %p1077_p5, %p1074_p3 }
  0x1e   : > { %1082 = shalt.err (!%p1079_p7)
}
  0x1f   : > { %s1083_s8 = scalar_lea.vmem %s1276_s23, 4608  ;;  %p1091_p2 = scmp.lt.s32.totalorder %s1276_s23, %s1276_s23 }
  0x20   : > { %p1084_p9 = scmp.ne.s32.totalorder %s1276_s23, %s1083_s8  ;;  %p1092_p6 = scmp.lt.s32.totalorder %s1083_s8, %s1083_s8 }
  0x22   : > { %p1086_p10 = pnand %p1084_p9, %p1072_p13  ;;  %p1093_p4 = por %p1092_p6, %p1091_p2 }
  0x24   : > { %p1087_p1 = pneg %p1086_p10 }
  0x26   : > { %p1094_p8 = pnand %p1093_p4, %p1087_p1 }
  0x28   : > { %1097 = shalt.err (!%p1094_p8)
}
  0x29   : > { %s1201_s9 = smov 64   ;;  %s1202_s10 = smov 4  }
  0x2a   : > { %968 = dma.hbm_to_vmem [thread:$0]  (!%p1283_p11), %s1447_s1, 4608, %s1276_s23, [#allocation7], %s1201_s9, %s1201_s9, %s1202_s10  }
  0x2b   : > { %p26_p2 = scmp.eq.s32.totalorder %s25_s27, 0  ;;  %p35_p1 = scmp.ne.s32.totalorder %s1194_s16, %s1190_s15 }
  0x2c   : > { %p36_p4 = scmp.eq.s32.totalorder %s1198_s17, 0  ;;  %p978_p6 = scmp.lt.s32.totalorder %s1198_s17, 2 }
  0x2d   : > { %s1319_s13 = scalar_select %p26_p2, %s1194_s16, %s28_s26  }
  0x2e   : > { %p37_p8 = por %p36_p4, %p35_p1  ;;  %p1457_p10 = scmp.eq.s32.totalorder %s1253_s2, 1 }
  0x2f   : > { %s149_s22 = sand.u32 1, %s1194_s16   ;;  %s955_s28 = smul.u32 1280, %s1198_s17 }
  0x30   : > { %p1323_p12 = por %p1457_p10, %p35_p1  ;;  %s954_s29 = smul.u32 80, %s149_s22 }
  0x31   : > { %s1332_s4 = scalar_lea.hbm %s1446_s0, %s955_s28  ;;  %p1334_p11 = pnand %p978_p6, %p37_p8 }
  0x32   : > { %s153_s26 = scalar_lea.vmem [#allocation3], %s954_s29  ;;  %s1340_s5 = scalar_lea.sflag [#allocation4], %s149_s22 }
  0x33   : > { %s161_s27 = sshll.u32 %s153_s26, 4  ;;  %s1098_s6 = scalar_lea.hbm %s1332_s4, 1280  ;;  %s1338_s27 = int_to_ptr.vmem [resolvable:$true] %s161_s27 }
  0x34   : > { %p1099_p13 = scmp.ne.s32.totalorder %s1332_s4, %s1098_s6  ;;  %p1100_p0 = pneg %p1334_p11 }
  0x35   : > { %s1103_s9 = scalar_lea.hbm %s1446_s0, 2560  ;;  %p1104_p7 = scmp.lt.u32.totalorder %s1332_s4, %s1446_s0 }
  0x36   : > { %p1101_p3 = pnand %p1100_p0, %p1099_p13  ;;  %p1105_p9 = scmp.lt.u32.totalorder %s1103_s9, %s1098_s6 }
  0x37   : > { %p1107_p1 = scmp.lt.u32.totalorder %s1098_s6, %s1332_s4 }
  0x38   : > { %p1102_p5 = pneg %p1101_p3  ;;  %p1106_p2 = por %p1105_p9, %p1104_p7 }
  0x3a   : > { %p1108_p4 = por %p1107_p1, %p1106_p2 }
  0x3c   : > { %p1109_p6 = pnand %p1108_p4, %p1102_p5 }
  0x3e   : > { %1112 = shalt.err (!%p1109_p6)
}
  0x3f   : > { %s1113_s12 = scalar_lea.vmem %s1338_s27, 1280  ;;  %s1203_s22 = smov [#allocation3]  }
  0x40   : > { %p1114_p8 = scmp.ne.s32.totalorder %s1338_s27, %s1113_s12  ;;  %s1118_s28 = sshll.u32 %s1203_s22, 4  ;;  %s1119_s28 = int_to_ptr.vmem [resolvable:$false] %s1118_s28 }
  0x41   : > { %s1120_s29 = scalar_lea.vmem %s1119_s28, 2560  ;;  %p1121_p3 = scmp.lt.s32.totalorder %s1338_s27, %s1119_s28 }
  0x42   : > { %p1116_p10 = pnand %p1114_p8, %p1100_p0  ;;  %p1122_p7 = scmp.lt.s32.totalorder %s1120_s29, %s1113_s12 }
  0x44   : > { %p1117_p13 = pneg %p1116_p10  ;;  %p1123_p9 = por %p1122_p7, %p1121_p3 }
  0x46   : > { %p1124_p2 = pnand %p1123_p9, %p1117_p13 }
  0x48   : > { %1127 = shalt.err (!%p1124_p2)
}
  0x49   : > { %s1204_s24 = smov 320   ;;  %s1205_s30 = smov 20  }
  0x4a   : > { %972 = dma.hbm_to_vmem [thread:$0]  (!%p1334_p11), %s1332_s4, 1280, %s1338_s27, %s1340_s5, %s1204_s24, %s1204_s24, %s1205_s30  }
  0x4b   : > { %p1460_p0 = scmp.ne.s32.totalorder %s1455_s21, 0 }
  0x4c   : > { %s1371_s26 = sand.u32 (!%p1460_p0), 1, %s1190_s15   ;;  %p1461_p5 = scmp.ne.s32.totalorder (!%p1460_p0), %s1453_s19, 0 }
  0x4d   : > { %173 = sbr.rel (%p1460_p0) target bundleno = 369 (0x171), region = 32  ;;  %s176_s7 = scalar_lea.sflag (!%p1460_p0), [#allocation4], %s1371_s26 }
  0x4e   : > { %s956_s6 = smul.u32 (!%p1460_p0), 80, %s1371_s26 }
  0x50   : > { %s1375_s8 = scalar_lea.vmem (!%p1460_p0), [#allocation3], %s956_s6 }
  0x54   : > { %1173 = dma.done.wait (%p1461_p5), %s176_s7, 1280  }
  0x55   : > { %1175 = vsyncadd (%p1461_p5), %s176_s7, 4294966016  ;;  %p1462_p11 = scmp.eq.s32.totalorder %s1253_s2, 0 }
  0x57   : > { %1177 = dma.done.wait (%p1462_p11), [#allocation7], 4608   ;;  %p1463_p1 = pmov %p1462_p11 }
  0x58   : > { %v1020_v0 = vld [vmem:[#allocation6 + $0x40] sm:$0xff]   ;;  %v1024_v4 = vld [vmem:[#allocation6 + $0x48] sm:$0xff]   ;;  %v1028_v8 = vld [vmem:[#allocation6 + $0x50] sm:$0xff]   ;;  %vm561_vm0 = vcmask 523264   ;;  %s293_s19 = sld [smem:[#allocation2]]  ;;  %s825_s21 = sshll.u32 %s1371_s26, 5 }
  0x59   : > { %1179 = vsyncadd (%p1463_p1), [#allocation7], 4294962688  ;;  %v1021_v1 = vld [vmem:[#allocation6] sm:$0xff]   ;;  %880 = vmatprep.subr.bf16.mxu0 %v1020_v0  ;;  %v1025_v5 = vld [vmem:[#allocation6 + $0x8] sm:$0xff]   ;;  %s205_s4 = scalar_lea.vmem [#allocation8], %s825_s21  ;;  %s879_s27 = sshll.u32 %s1253_s2, 9 }
  0x5a   : > { %v1022_v2 = vld [vmem:[#allocation6 + $0xc0] sm:$0xff]   ;;  %881 = vmatpush3.bf16.msra.mxu0 %v1021_v1  ;;  %v1026_v6 = vld [vmem:[#allocation6 + $0xc8] sm:$0xff]   ;;  %v1029_v9 = vld [vmem:[#allocation6 + $0x10] sm:$0xff]   ;;  %s733_s23 = sshll.u32 %s205_s4, 4  ;;  %s1402_s10 = scalar_lea.hbm %s1449_s3, %s879_s27  ;;  %s1397_s23 = int_to_ptr.vmem [resolvable:$true] %s733_s23 }
  0x5b   : > { %v1023_v3 = vld [vmem:[#allocation6 + $0x80] sm:$0xff]   ;;  %908 = vmatprep.subr.bf16.mxu1 %v1022_v2  ;;  %882 = vmatprep.subr.bf16.mxu0 %v1024_v4  ;;  %v1027_v7 = vld [vmem:[#allocation6 + $0x88] sm:$0xff]   ;;  %v1030_v10 = vld [vmem:[#allocation6 + $0xd0] sm:$0xff]   ;;  %s720_s2 = scalar_lea.sflag [#allocation5], %s1371_s26  ;;  %s1128_s11 = scalar_lea.vmem %s1397_s23, 512 }
  0x5c   : > { %909 = vmatpush3.bf16.msra.mxu1 %v1023_v3  ;;  %v1031_v11 = vld [vmem:[#allocation6 + $0x90] sm:$0xff]   ;;  %v1032_v12 = vld [vmem:[#allocation6 + $0x58] sm:$0xff]   ;;  %v1036_v16 = vld [vmem:[#allocation6 + $0x60] sm:$0xff]   ;;  %p1129_p4 = scmp.ne.s32.totalorder %s1397_s23, %s1128_s11  ;;  %s1206_s12 = smov [#allocation8]  }
  0x5d   : > { %910 = vmatprep.subr.bf16.mxu1 %v1026_v6  ;;  %v1033_v13 = vld [vmem:[#allocation6 + $0x18] sm:$0xff]   ;;  %v1037_v17 = vld [vmem:[#allocation6 + $0x20] sm:$0xff]   ;;  %v1040_v20 = vld [vmem:[#allocation6 + $0x68] sm:$0xff]   ;;  %s1132_s22 = sshll.u32 %s1206_s12, 4  ;;  %s1133_s22 = int_to_ptr.vmem [resolvable:$false] %s1132_s22 }
  0x5e   : > { %883 = vmatpush3.bf16.msra.mxu0 %v1025_v5  ;;  %v1034_v14 = vld [vmem:[#allocation6 + $0xd8] sm:$0xff]   ;;  %v1038_v18 = vld [vmem:[#allocation6 + $0xe0] sm:$0xff]   ;;  %v1041_v21 = vld [vmem:[#allocation6 + $0x28] sm:$0xff]   ;;  %v294_v47 = vstv %s293_s19  ;;  %p1130_p6 = pnand %p1129_p4, %p1323_p12  ;;  %s1134_s28 = scalar_lea.vmem %s1133_s22, 1024 }
  0x5f   : > { %884 = vmatprep.subr.bf16.mxu0 %v1028_v8  ;;  %v1035_v15 = vld [vmem:[#allocation6 + $0x98] sm:$0xff]   ;;  %v1039_v19 = vld [vmem:[#allocation6 + $0xa0] sm:$0xff]   ;;  %v1042_v22 = vld [vmem:[#allocation6 + $0xe8] sm:$0xff]   ;;  %p1135_p10 = scmp.lt.s32.totalorder %s1397_s23, %s1133_s22  ;;  %p1136_p13 = scmp.lt.s32.totalorder %s1134_s28, %s1128_s11 }
  0x60   : > { %911 = vmatpush3.bf16.msra.mxu1 %v1027_v7  ;;  %v1043_v23 = vld [vmem:[#allocation6 + $0xa8] sm:$0xff]   ;;  %v1044_v24 = vld [vmem:[#allocation6 + $0x70] sm:$0xff]   ;;  %v1048_v28 = vld [vmem:[#allocation6 + $0x78] sm:$0xff]   ;;  %p1131_p8 = pneg %p1130_p6 }
  0x61   : > { %912 = vmatprep.subr.bf16.mxu1 %v1030_v10  ;;  %v1045_v25 = vld [vmem:[#allocation6 + $0x30] sm:$0xff]   ;;  %v1049_v29 = vld [vmem:[#allocation6 + $0x38] sm:$0xff]   ;;  %v1055_v34 = vld [vmem:[#allocation6 + $0x100] sm:$0xff]   ;;  %p1137_p3 = por %p1136_p13, %p1135_p10 }
  0x62   : > { %885 = vmatpush3.bf16.msra.mxu0 %v1029_v9  ;;  %v1046_v26 = vld [vmem:[#allocation6 + $0xf0] sm:$0xff]   ;;  %v1050_v30 = vld [vmem:[#allocation6 + $0xf8] sm:$0xff]   ;;  %v1059_v37 = vld [vmem:[#allocation6 + $0x108] sm:$0xff]  }
  0x63   : > { %886 = vmatprep.subr.bf16.mxu0 %v1032_v12  ;;  %v1047_v27 = vld [vmem:[#allocation6 + $0xb0] sm:$0xff]   ;;  %v1054_v33 = vld [vmem:[#allocation6 + $0xb8] sm:$0xff]   ;;  %p1138_p7 = pnand %p1137_p3, %p1131_p8 }
  0x64   : > { %913 = vmatpush3.bf16.msra.mxu1 %v1031_v11  ;;  %v1051_v31 = vld [vmem:[%s1375_s8] ss:$20 sps:$4 sm:$0xff]   ;;  %v1053_v32 = vld [vmem:[%s1375_s8 + $0x4] ss:$20 sps:$4 sm:$0xff]   ;;  %v1056_v35 = vld [vmem:[%s1375_s8 + $0x8] ss:$20 sps:$4 sm:$0xff]  }
  0x65   : > { %914 = vmatprep.subr.bf16.mxu1 %v1034_v14  ;;  %600 = vmatprep.mubr.bf16.mxu0 %v1053_v32  ;;  %v1058_v36 = vld [vmem:[%s1375_s8 + $0xc] ss:$20 sps:$4 sm:$0xff]   ;;  %v1062_v39 = vld [vmem:[%s1375_s8 + $0x28] ss:$20 sps:$4 sm:$0xff]   ;;  %v1066_v42 = vld [vmem:[%s1375_s8 + $0x30] ss:$20 sps:$4 sm:$0xff]  }
  0x66   : > { %887 = vmatpush3.bf16.msra.mxu0 %v1033_v13  ;;  %649 = vmatprep.mubr.bf16.mxu1 %v1058_v36  ;;  %v1060_v38 = vld [vmem:[%s1375_s8 + $0x2c] ss:$20 sps:$4 sm:$0xff]   ;;  %v1064_v41 = vld [vmem:[%s1375_s8 + $0x34] ss:$20 sps:$4 sm:$0xff]   ;;  %v1068_v44 = vld [vmem:[%s1375_s8 + $0x10] ss:$20 sps:$4 sm:$0xff]  }
  0x67   : > { %888 = vmatprep.subr.bf16.mxu0 %v1036_v16  ;;  %v1063_v40 = vld [vmem:[#allocation6 + $0x110] sm:$0xff]   ;;  %v1067_v43 = vld [vmem:[#allocation6 + $0x118] sm:$0xff]  }
  0x68   : > { %915 = vmatpush3.bf16.msra.mxu1 %v1035_v15  ;;  %v1069_v45 = vld [vmem:[%s1375_s8 + $0x38] ss:$20 sps:$4 sm:$0xff]  }
  0x69   : > { %916 = vmatprep.subr.bf16.mxu1 %v1038_v18 }
  0x6a   : > { %889 = vmatpush3.bf16.msra.mxu0 %v1037_v17 }
  0x6b   : > { %890 = vmatprep.subr.bf16.mxu0 %v1040_v20 }
  0x6c   : > { %917 = vmatpush3.bf16.msra.mxu1 %v1039_v19 }
  0x6d   : > { %918 = vmatprep.subr.bf16.mxu1 %v1042_v22 }
  0x6e   : > { %891 = vmatpush3.bf16.msra.mxu0 %v1041_v21 }
  0x6f   : > { %892 = vmatprep.subr.bf16.mxu0 %v1044_v24 }
  0x70   : > { %919 = vmatpush3.bf16.msra.mxu1 %v1043_v23 }
  0x71   : > { %920 = vmatprep.subr.bf16.mxu1 %v1046_v26 }
  0x72   : > { %893 = vmatpush3.bf16.msra.mxu0 %v1045_v25 }
  0x73   : > { %894 = vmatprep.subr.bf16.mxu0 %v1048_v28 }
  0x74   : > { %921 = vmatpush3.bf16.msra.mxu1 %v1047_v27 }
  0x75   : > { %922 = vmatprep.subr.bf16.mxu1 %v1050_v30 }
  0x76   : > { %895 = vmatpush3.bf16.msra.mxu0 %v1049_v29 }
  0x77   : > { %942 = vmatprep.subr.bf16.mxu0 %v1055_v34 }
  0x78   : > { %923 = vmatpush3.bf16.msra.mxu1 %v1054_v33 }
  0x79   : > { %601 = vmatmul.mubr.bf16.vlgmr.msra.gmra.mrb[0].mxu0 %v1051_v31 }
  0x7a   : > { %943 = vmatpush3.bf16.msra.mxu0 %v1055_v34  ;;  %608 = vmatprep.mubr.bf16.mxu0 %v1060_v38 }
  0x7b   : > { %650 = vmatmul.mubr.bf16.vlgmr.msra.gmra.mrb[0].mxu1 %v1056_v35  ;;  %944 = vmatprep.subr.bf16.mxu0 %v1059_v37 }
  0x7c   : > { %657 = vmatprep.mubr.bf16.mxu1 %v1064_v41 }
  0x7e   : > { %945 = vmatpush3.bf16.msra.mxu0 %v1059_v37 }
  0x7f   : > { %946 = vmatprep.subr.bf16.mxu0 %v1063_v40 }
  0x81   : > { %609 = vmatmul.mubr.bf16.gmra.mrb[4].mxu0 %v1062_v39 }
  0x82   : > { %950 = vmatprep.mubr.msk.bf16.mxu0 %vm561_vm0, %v1068_v44  ;;  %947 = vmatpush3.bf16.msra.mxu0 %v1063_v40 }
  0x83   : > { %658 = vmatmul.mubr.bf16.gmra.mrb[4].mxu1 %v1066_v42  ;;  %948 = vmatprep.subr.bf16.mxu0 %v1067_v43 }
  0x86   : > { %949 = vmatpush3.bf16.msra.mxu0 %v1067_v43 }
  0x89   : > { %951 = vmatmul.mubr.msk.bf16.vlgmr.msra.gmra.mrb[8].mxu0 %vm561_vm0, %v1069_v45 }
 0x14c   : > { %v896_v46 = vpop.f32.mrb[0].mxu0 }
 0x14d   : > { %v897_v48 = vpop.f32.mrb[1].mxu0 }
 0x14e   : > { %v898_v49 = vadd.f32 %v897_v48, %v896_v46  ;;  %v899_v50 = vpop.f32.mrb[2].mxu0  ;;  %v924_v51 = vpop.f32.mrb[0].mxu1 }
 0x14f   : > { %v900_v52 = vpop.f32.mrb[3].mxu0  ;;  %v925_v55 = vpop.f32.mrb[1].mxu1 }
 0x150   : > { %v603_v53 = vadd.f32 %v898_v49, %v294_v47  ;;  %v901_v54 = vadd.f32 %v900_v52, %v899_v50  ;;  %v926_v56 = vadd.f32 %v925_v55, %v924_v51  ;;  %v927_v57 = vpop.f32.mrb[2].mxu1 }
 0x151   : > { %v928_v59 = vpop.f32.mrb[3].mxu1 }
 0x152   : > { %v606_v58 = vadd.f32 %v901_v54, %v294_v47  ;;  %v929_v60 = vadd.f32 %v928_v59, %v927_v57  ;;  %v652_v61 = vadd.f32 %v926_v56, %v603_v53 }
 0x154   : > { %v902_v62 = vpop.f32.mrb[4].mxu0  ;;  %v655_v0 = vadd.f32 %v929_v60, %v606_v58 }
 0x155   : > { %v903_v63 = vpop.f32.mrb[5].mxu0 }
 0x156   : > { %v904_v1 = vadd.f32 %v903_v63, %v902_v62  ;;  %v905_v2 = vpop.f32.mrb[6].mxu0  ;;  %v930_v3 = vpop.f32.mrb[4].mxu1 }
 0x157   : > { %v906_v4 = vpop.f32.mrb[7].mxu0  ;;  %v931_v7 = vpop.f32.mrb[5].mxu1 }
 0x158   : > { %v611_v5 = vadd.f32 %v904_v1, %v294_v47  ;;  %v907_v6 = vadd.f32 %v906_v4, %v905_v2  ;;  %v932_v8 = vadd.f32 %v931_v7, %v930_v3  ;;  %v933_v9 = vpop.f32.mrb[6].mxu1 }
 0x159   : > { %v934_v11 = vpop.f32.mrb[7].mxu1 }
 0x15a   : > { %v614_v10 = vadd.f32 %v907_v6, %v294_v47  ;;  %v935_v12 = vadd.f32 %v934_v11, %v933_v9  ;;  %v660_v13 = vadd.f32 %v932_v8, %v611_v5 }
 0x15c   : > { %v952_v14 = vpop.f32.mrb[8].mxu0  ;;  %v663_v15 = vadd.f32 %v935_v12, %v614_v10 }
 0x15d   : > { %v709_v16 = vadd.f32 %v952_v14, %v660_v13  ;;  %v700_v17 = vpop.f32.mrb[9].mxu0 }
 0x15e   : > { %v701_v18 = vadd.f32 %v700_v17, %v652_v61  ;;  %v953_v19 = vpop.f32.mrb[10].mxu0 }
 0x15f   : > { %717 = vst [vmem:[%s205_s4 + $0x10] sm:$0xff] %v709_v16  ;;  %v712_v20 = vadd.f32 %v953_v19, %v663_v15  ;;  %v703_v21 = vpop.f32.mrb[11].mxu0 }
 0x160   : > { %715 = vst [vmem:[%s205_s4] sm:$0xff] %v701_v18  ;;  %v704_v22 = vadd.f32 %v703_v21, %v655_v0 }
 0x161   : > { %718 = vst [vmem:[%s205_s4 + $0x18] sm:$0xff] %v712_v20 }
 0x162   : > { %716 = vst [vmem:[%s205_s4 + $0x8] sm:$0xff] %v704_v22 }
 0x163   : > { %1141 = shalt.err (!%p1138_p7)
}
 0x164   : > { %s1142_s29 = scalar_lea.hbm %s1402_s10, 512  ;;  %s1146_s6 = scalar_lea.hbm %s1449_s3, 1024 }
 0x165   : > { %p1143_p9 = scmp.ne.s32.totalorder %s1402_s10, %s1142_s29  ;;  %p1147_p5 = scmp.lt.u32.totalorder %s1402_s10, %s1449_s3 }
 0x166   : > { %p1148_p11 = scmp.lt.u32.totalorder %s1146_s6, %s1142_s29  ;;  %p1150_p4 = scmp.lt.u32.totalorder %s1142_s29, %s1402_s10 }
 0x167   : > { %p1144_p2 = pnand %p1143_p9, %p1323_p12 }
 0x168   : > { %p1149_p1 = por %p1148_p11, %p1147_p5 }
 0x169   : > { %p1145_p0 = pneg %p1144_p2 }
 0x16a   : > { %p1151_p6 = por %p1150_p4, %p1149_p1 }
 0x16c   : > { %p1152_p8 = pnand %p1151_p6, %p1145_p0 }
 0x16e   : > { %1155 = shalt.err (!%p1152_p8)
}
 0x16f   : > { %s1207_s19 = smov 128   ;;  %s1208_s21 = smov 8  }
 0x170   : > { %963 = dma.vmem_to_hbm [thread:$0]  (%p1323_p12), %s1397_s23, 512, %s1402_s10, %s720_s2, %s1207_s19, %s1207_s19, %s1208_s21  }
 0x171 PF: > { %s748_s4 = sand.u32 1, %s1186_s14   ;;  %p1464_p10 = scmp.ne.s32.totalorder %s1454_s20, 0 }
 0x172   : > { %p1465_p13 = scmp.ge.s32.totalorder %s1198_s17, 2  ;;  %s749_s27 = scalar_lea.sflag [#allocation5], %s748_s4 }
 0x174   : > { %p974_p3 = pnand %p1465_p13, %p1464_p10 }
 0x176   : > { %1181 = dma.done.wait (!%p974_p3), %s749_s27, 512  }
 0x177   : > { %1183 = vsyncadd (!%p974_p3), %s749_s27, 4294966784  ;;  %p18_p7 = scmp.ge.s32.totalorder %s1288_s25, 4   ;;  %s1466_s14 = smov %s1190_s15 }
 0x178   : > { %s1467_s15 = smov %s1194_s16  ;;  %s1468_s16 = smov %s1319_s13 }
 0x179   : > { %s1469_s17 = smov %s1288_s25  ;;  %20 = sbr.rel (!%p18_p7) target bundleno = 8 (0x8), region = 81 }
 0x180   :  { %754 = vsyncpa [#allocation4], 1 }
 0x181   :  { %756 = vsyncpa [#allocation4 + $0x1], 1 }
 0x182   :  { %757 = vsyncpa [#allocation7], 1 }
 0x183   :  { %758 = vsyncpa [#allocation5], 1 }
 0x184   :  { %760 = vsyncpa [#allocation5 + $0x1], 1 }

</bundles_post_ra>
